<compile_context>
chip_gen: v7x
topology: tpu7x:2x2x1
jax: 0.10.0
libtpu: 0.0.40
codegen_flags: <defaults>
</compile_context>

<pallas_src>
import math
from copy import deepcopy

import numpy as np
import jax
import jax.numpy as jnp
from jax.experimental import pallas as pl
from jax.experimental.pallas import tpu as pltpu


# -----------------------------------------------------------------------------
# Exact ports of the provided numpy helpers (pure glue, no heavy compute)
# -----------------------------------------------------------------------------
def get_preprocess_shape(oldh, oldw, long_side_length):
    scale = long_side_length * 1.0 / max(oldh, oldw)
    newh, neww = oldh * scale, oldw * scale
    return int(newh + 0.5), int(neww + 0.5)


def apply_coords(coords, original_size, target_length):
    old_h, old_w = original_size
    new_h, new_w = get_preprocess_shape(original_size[0], original_size[1], target_length)
    coords = deepcopy(coords).astype(float)
    coords[..., 0] = coords[..., 0] * (new_w / old_w)
    coords[..., 1] = coords[..., 1] * (new_h / old_h)
    return coords


def batch_iterator(batch_size, *args):
    assert len(args) > 0 and all(len(a) == len(args[0]) for a in args), \
        "Batched iteration must have inputs of all the same size."
    n_batches = len(args[0]) // batch_size + int(len(args[0]) % batch_size != 0)
    for b in range(n_batches):
        yield [arg[b * batch_size:(b + 1) * batch_size] for arg in args]


def build_point_grid(n_per_side):
    offset = 1 / (2 * n_per_side)
    points_one_side = np.linspace(offset, 1 - offset, n_per_side)
    points_x = np.tile(points_one_side[None, :], (n_per_side, 1))
    points_y = np.tile(points_one_side[:, None], (1, n_per_side))
    return np.stack([points_x, points_y], axis=-1).reshape(-1, 2)


def build_all_layer_point_grids(n_per_side, n_layers, scale_per_layer):
    return [build_point_grid(int(n_per_side / scale_per_layer ** i))
            for i in range(n_layers + 1)]


# -----------------------------------------------------------------------------
# VMEM budget (generation-aware) and tiling helpers
# -----------------------------------------------------------------------------
def _tpu_vmem_capacity_bytes():
    try:
        info = pltpu.get_tpu_info()
        cap = getattr(info, "vmem_capacity_bytes", None)
        if cap:
            return int(cap)
    except Exception:
        pass
    return 64 << 20  # conservative fallback (v7x per-TC VMEM)


_VMEM_CAPACITY = _tpu_vmem_capacity_bytes()
_VMEM_LIMIT = min(int(0.75 * _VMEM_CAPACITY), 100 << 20)   # requested scoped-VMEM limit
_VMEM_BUDGET = int(0.6 * _VMEM_LIMIT)                      # what our tiles may consume


def _pick_tile(n, cap, align):
    """Largest tile <= cap that divides n and is a multiple of `align`
    (falls back to the full extent, which is always a legal block)."""
    if n <= cap:
        return n
    for d in range(cap, 0, -1):
        if n % d == 0 and d % align == 0:
            return d
    return n


def _resize_row_tile(H, h, w, W, budget):
    """Output-row tile for the fused resize kernel, sized from the VMEM budget.
    Prefers MXU-filling multiples of 256, then multiples of 8."""
    def cost(th):
        return (2 * h * w * 4        # f32 input mask tile (double-buffered)
                + 2 * th * h * 2     # bf16 A_h row tile (double-buffered)
                + 2 * w * W * 2      # bf16 A_w^T (constant, double-buffered)
                + 2 * th * W * 4     # f32 output tile (double-buffered)
                + h * W * 2)         # bf16 column-pass scratch
    divisors = [d for d in range(H, 0, -1) if H % d == 0]
    for align in (256, 8):
        for d in divisors:
            if d % align == 0 and cost(d) <= budget:
                return d
    mult8 = [d for d in divisors if d % 8 == 0]
    return min(mult8) if mult8 else H


# -----------------------------------------------------------------------------
# Pallas kernel 1: random-Fourier positional encoding (PositionEmbeddingRandom)
#   pe = [sin(2*pi*((2c-1) @ G)), cos(2*pi*((2c-1) @ G))]
# The 2x-1 affine and the 2*pi scale are folded into (gmat, gbias) on host, so
# the kernel is a K=2 broadcast-multiply-add plus EUP sin/cos, with the results
# written straight into output slices (no concat, no per-element rescale).
# Lane-dense layout: coords (2, N), gmat (F, 2), gbias (F, 1) -> out (2F, N),
# which already matches the (C, s, s) channel-first layout get_dense_pe wants.
# -----------------------------------------------------------------------------
def _pe_encoding_kernel(coords_ref, gmat_ref, gbias_ref, out_ref):
    c = coords_ref[...]                                      # (2, N), in [0, 1]
    g = gmat_ref[...]                                        # (F, 2), pre-scaled
    proj = g[:, 0:1] * c[0:1, :] + g[:, 1:2] * c[1:2, :] + gbias_ref[...]   # (F, N)
    f = g.shape[0]
    out_ref[0:f, :] = jnp.sin(proj)
    out_ref[f:, :] = jnp.cos(proj)


def pe_encoding_dense(coords_2n, gauss_2f):
    """coords_2n: (2, N) normalized to [0, 1]; gauss_2f: (2, F). Returns (2F, N)."""
    _, n = coords_2n.shape
    f = gauss_2f.shape[1]
    gmat = (4.0 * math.pi) * jnp.transpose(gauss_2f)                     # (F, 2)
    gbias = (-2.0 * math.pi) * jnp.sum(gauss_2f, axis=0)[:, None]        # (F, 1)
    return pl.pallas_call(
        _pe_encoding_kernel,
        out_shape=jax.ShapeDtypeStruct((2 * f, n), jnp.float32),
    )(coords_2n.astype(jnp.float32), gmat.astype(jnp.float32),
      gbias.astype(jnp.float32))


# -----------------------------------------------------------------------------
# Pallas kernel 2: fused separable bilinear resize
#   out[n] = A_h @ m[n] @ A_w^T   with A_h / A_w already composed from
#   (resize->img_size, crop to input_size, resize->original_size).
# Grid = (N, H // TH):
#   * column pass (m @ A_w^T) computed ONCE per image, cached as **bf16** in
#     VMEM scratch (single cast at r == 0; no per-row-tile re-cast)
#   * row pass row-tiled (TH output rows per step) -> MXU, bf16 in / f32 acc
#   * input masks stay f32 in HBM (no standalone host-side cast pass); the
#     bf16 cast happens on the per-image tile inside the kernel.
# NOTE: the interpolation chain runs in bf16 on the MXU (f32 accumulate);
#       relative error vs torch fp32 F.interpolate is ~1e-3.
# -----------------------------------------------------------------------------
def _fused_resize_kernel(m_ref, ah_ref, awt_ref, out_ref, tmp_ref):
    r = pl.program_id(1)

    @pl.when(r == 0)
    def _():
        # column pass: (h, w) @ (w, W) -> (h, W); cast result to bf16 ONCE.
        tmp_ref[...] = jnp.dot(
            m_ref[0].astype(jnp.bfloat16), awt_ref[...],
            preferred_element_type=jnp.float32).astype(jnp.bfloat16)

    # row pass for this row tile: (TH, h) @ (h, W) -> (TH, W)
    out_ref[0] = jnp.dot(ah_ref[...], tmp_ref[...],
                         preferred_element_type=jnp.float32).astype(out_ref.dtype)


def separable_resize(x, ah_np, awt_np):
    """x: (B, C, h, w) -> (B, C, H, W) with out[b,c] = ah @ x[b,c] @ awt."""
    B, C, h, w = x.shape
    H = ah_np.shape[0]
    W = awt_np.shape[1]
    N = B * C
    TH = _resize_row_tile(H, h, w, W, _VMEM_BUDGET)

    xf = x.reshape(N, h, w)                            # keep producer dtype; cast in-kernel
    ah = jnp.asarray(ah_np, dtype=jnp.bfloat16)        # (H, h)
    awt = jnp.asarray(awt_np, dtype=jnp.bfloat16)      # (w, W)

    out = pl.pallas_call(
        _fused_resize_kernel,
        out_shape=jax.ShapeDtypeStruct((N, H, W), jnp.float32),
        grid=(N, H // TH),
        in_specs=[
            pl.BlockSpec((1, h, w), lambda n, r: (n, 0, 0)),   # per-image mask
            pl.BlockSpec((TH, h), lambda n, r: (r, 0)),        # row-tile of A_h
            pl.BlockSpec((w, W), lambda n, r: (0, 0)),         # constant A_w^T
        ],
        out_specs=pl.BlockSpec((1, TH, W), lambda n, r: (n, r, 0)),
        scratch_shapes=[pltpu.VMEM((h, W), jnp.bfloat16)],     # bf16 column-pass cache
        compiler_params=pltpu.CompilerParams(
            dimension_semantics=("parallel", "arbitrary"),
            vmem_limit_bytes=_VMEM_LIMIT),
    )(xf, ah, awt)
    return out.reshape(B, C, H, W)
    # TODO(synk): at full SAM scale, fusing the loss partial sums into this kernel's
    # epilogue (or emitting bf16 masks) would avoid the multi-GiB HBM round trip of
    # the full-resolution masks; kept f32 here to preserve forward semantics.


def _bilinear_matrix(in_size, out_size):
    """Row-interp matrix matching torch F.interpolate(mode='bilinear', align_corners=False)."""
    A = np.zeros((out_size, in_size), np.float32)
    if in_size == 1:
        A[:, 0] = 1.0
        return A
    scale = in_size / out_size
    for i in range(out_size):
        src = max((i + 0.5) * scale - 0.5, 0.0)
        i0 = min(int(np.floor(src)), in_size - 1)
        i1 = min(i0 + 1, in_size - 1)
        l1 = src - i0
        A[i, i0] += 1.0 - l1
        A[i, i1] += l1
    return A


def _composed_resize_matrix(in_size, img_size, crop_size, out_size):
    """Compose: resize in_size->img_size, crop to crop_size, resize crop_size->out_size."""
    A1 = _bilinear_matrix(in_size, img_size)[:crop_size, :]   # (crop, in)
    A2 = _bilinear_matrix(crop_size, out_size)                # (out, crop)
    return (A2 @ A1).astype(np.float32)                       # (out, in)


# -----------------------------------------------------------------------------
# Pallas kernel 3: ONE fused loss partial-sum pass (iou + BCE + BBCE)
# Per (b, c) row, accumulated in VMEM scratch over reduction tiles:
#   col0: inter = sum(sigmoid(x) * y)
#   col1: total = sum(sigmoid(x) + y)
#   col2: s_pos = sum(y)
#   col3: s_a   = sum((1-y) * (x + softplus(-x)))
#   col4: s_b   = sum(y * softplus(-x))
# Lane-slice accumulator updates (no per-step concatenate); single finalize store.
# pred / gt are consumed in their native dtypes (gt may be bf16: exact for 0/1).
# -----------------------------------------------------------------------------
def _fused_loss_kernel(pred_ref, gt_ref, out_ref, acc_ref):
    l = pl.program_id(1)

    @pl.when(l == 0)
    def _():
        acc_ref[...] = jnp.zeros_like(acc_ref)

    x = pred_ref[...].astype(jnp.float32)
    y = gt_ref[...].astype(jnp.float32)
    p = 1.0 / (1.0 + jnp.exp(-x))                                         # sigmoid (EUP)
    sp = jnp.maximum(-x, 0.0) + jnp.log(1.0 + jnp.exp(-jnp.abs(x)))       # softplus(-x), stable

    acc_ref[:, 0:1] += jnp.sum(p * y, axis=-1, keepdims=True)
    acc_ref[:, 1:2] += jnp.sum(p + y, axis=-1, keepdims=True)
    acc_ref[:, 2:3] += jnp.sum(y, axis=-1, keepdims=True)
    acc_ref[:, 3:4] += jnp.sum((1.0 - y) * (x + sp), axis=-1, keepdims=True)
    acc_ref[:, 4:5] += jnp.sum(y * sp, axis=-1, keepdims=True)

    @pl.when(l == pl.num_programs(1) - 1)
    def _():
        out_ref[...] = acc_ref[...]


def _loss_partial_sums(pred, gt):
    assert pred.ndim >= 2
    L = int(pred.shape[-1]) * int(pred.shape[-2])
    R = int(np.prod(pred.shape)) // L
    p2 = pred.reshape(R, L)
    g2 = gt.reshape(R, L)

    TR = _pick_tile(R, 256, 8)
    if R // TR < 2:                       # keep >= 2 row tiles so v7x's 2 TCs both get work
        tr2 = _pick_tile(R, max(R // 2, 1), 8)
        if tr2 < R:
            TR = tr2
    bytes_per_lane = 2 * TR * (p2.dtype.itemsize + g2.dtype.itemsize)     # double-buffered inputs
    max_tl = max(_VMEM_BUDGET // max(bytes_per_lane, 1), 128)
    TL = _pick_tile(L, min(8192, max_tl), 128)

    sums = pl.pallas_call(
        _fused_loss_kernel,
        out_shape=jax.ShapeDtypeStruct((R, 8), jnp.float32),
        grid=(R // TR, L // TL),
        in_specs=[pl.BlockSpec((TR, TL), lambda r, l: (r, l)),
                  pl.BlockSpec((TR, TL), lambda r, l: (r, l))],
        out_specs=pl.BlockSpec((TR, 8), lambda r, l: (r, 0)),
        scratch_shapes=[pltpu.VMEM((TR, 8), jnp.float32)],
        compiler_params=pltpu.CompilerParams(
            dimension_semantics=("parallel", "arbitrary"),
            vmem_limit_bytes=_VMEM_LIMIT),
    )(p2, g2)
    return sums, R, L


def _losses_from_sums(sums, R, L):
    numel = float(R * L)
    inter = sums[:, 0]
    union = sums[:, 1] - inter
    # NOTE: no smoothing term, to match the reference torch _iou_loss exactly.
    iou = jnp.mean(1.0 - inter / union)

    s_pos = jnp.sum(sums[:, 2])
    s_a = jnp.sum(sums[:, 3])
    s_b = jnp.sum(sums[:, 4])
    bce = (s_a + s_b) / numel

    eps = 1e-10
    count_pos = s_pos + eps
    count_neg = numel - s_pos
    ratio = count_neg / count_pos
    w_neg = count_pos / (count_pos + count_neg)
    bbce = w_neg * (s_a + ratio * s_b) / numel
    return iou, bce, bbce


def all_losses(pred, gt):
    """One fused HBM pass over (pred, gt) -> (bbce, bce, iou) losses."""
    sums, R, L = _loss_partial_sums(pred, gt)
    iou, bce, bbce = _losses_from_sums(sums, R, L)
    return bbce, bce, iou


def iou_loss(pred, target):
    return all_losses(pred, target)[2]


def bce_with_logits_loss(pred, gt):
    """Plain nn.BCEWithLogitsLoss (mean reduction)."""
    return all_losses(pred, gt)[1]


def bbce_with_logits_loss(pred, gt):
    """BBCEWithLogitLoss: balanced BCE-with-logits."""
    return all_losses(pred, gt)[0]


# -----------------------------------------------------------------------------
# AutomaticSAM (forward path) with Pallas kernels for the provided compute
# -----------------------------------------------------------------------------
class AutomaticSAMPallas:
    def __init__(self, inp_size, encoder_mode, loss='iou', key=None,
                 point_per_side=32, points_per_batch=64):
        # Original module hardcodes point_per_side=32, points_per_batch=64;
        # exposed here so the demo can run at small scale.
        self.point_per_side = point_per_side
        self.points_per_batch = points_per_batch
        self.inp_size = inp_size
        self.embed_dim = encoder_mode['embed_dim']
        self.prompt_embed_dim = encoder_mode['prompt_embed_dim']
        self.out_chans = encoder_mode['out_chans']
        self.image_embedding_size = inp_size // encoder_mode['patch_size']
        self.img_size = inp_size  # image_encoder.img_size
        self.loss_mode = loss

        key = jax.random.PRNGKey(0) if key is None else key
        k1, k2, k3 = jax.random.split(key, 3)
        # PositionEmbeddingRandom buffer: scale * randn((2, num_pos_feats)); scale=1.0
        self.pe_gaussian = jax.random.normal(k1, (2, self.prompt_embed_dim // 2), jnp.float32)
        # nn.Embedding(1, prompt_embed_dim).weight
        self.no_mask_embed = jax.random.normal(k2, (1, self.prompt_embed_dim), jnp.float32) * 0.02
        # deterministic projection used by the encoder stand-in
        self._feat_proj = jax.random.normal(k3, (3, self.out_chans), jnp.float32) * 0.1
        # TODO(synk): ImageEncoderViT / PromptEncoder / MaskDecoder / TwoWayTransformer source
        #             is not part of this module; deterministic stand-ins are used below.

    # ---- PositionEmbeddingRandom.forward + get_dense_pe (Pallas PE kernel) ----
    def get_dense_pe(self):
        s = self.image_embedding_size
        # grid.cumsum - 0.5 over ones == (idx + 0.5); then normalized by h / w
        x = (jnp.arange(s, dtype=jnp.float32) + 0.5) / s
        y = (jnp.arange(s, dtype=jnp.float32) + 0.5) / s
        xx, yy = jnp.meshgrid(x, y)                    # xx[i,j]=x[j], yy[i,j]=y[i]
        coords = jnp.stack([xx.reshape(-1), yy.reshape(-1)], axis=0)   # (2, s*s), lane-dense
        pe = pe_encoding_dense(coords, self.pe_gaussian)               # (2F, s*s)
        return pe.reshape(1, self.prompt_embed_dim, s, s)              # (1, C, s, s)

    # ---- stand-ins for external SAM sub-networks (deterministic) ----
    def _placeholder_image_features(self, x):
        # TODO(synk): ImageEncoderViT not provided; deterministic patch-mean + fixed projection.
        B = x.shape[0]
        E = self.image_embedding_size
        p = self.inp_size // E
        patches = x.reshape(B, 3, E, p, E, p).mean(axis=(3, 5))            # (B, 3, E, E)
        return jnp.einsum('bchw,cd->bdhw', patches, self._feat_proj)       # (B, out_chans, E, E)

    def _placeholder_mask_decoder(self, feature, image_pe, in_points, in_labels):
        # TODO(synk): PromptEncoder + MaskDecoder(TwoWayTransformer) not provided; deterministic
        #             low-res masks (one per point) at 4x embedding resolution.
        low = 4 * self.image_embedding_size
        fmean = feature.mean() + image_pe.mean()
        px = in_points[:, 0, 0] / self.inp_size
        py = in_points[:, 0, 1] / self.inp_size
        gx, gy = jnp.meshgrid(jnp.linspace(0.0, 1.0, low), jnp.linspace(0.0, 1.0, low))
        m = -((gx[None] - px[:, None, None]) ** 2 +
              (gy[None] - py[:, None, None]) ** 2) * 40.0 + fmean
        return m[:, None, :, :]                                            # (P, 1, low, low)

    # ---- postprocess_masks: fused (resize -> crop -> resize) as ONE Pallas call ----
    def postprocess_masks(self, masks, input_size, original_size):
        _, _, lh, lw = masks.shape
        ah = _composed_resize_matrix(lh, self.img_size, input_size, original_size)      # (orig, lh)
        awt = _composed_resize_matrix(lw, self.img_size, input_size, original_size).T   # (lw, orig)
        return separable_resize(masks, ah, awt)

    # ---- AutomaticSAM.forward ----
    def forward(self, x):
        bs = x.shape[0]
        orig_size = tuple(int(v) for v in x.shape[2:])

        self.features = self._placeholder_image_features(x)

        points_scale = np.array(orig_size)
        points_for_image = build_all_layer_point_grids(self.point_per_side, 0, 1)[0] * points_scale

        dense_pe = self.get_dense_pe()
        batch_size = self.features.shape[0]
        for i in range(batch_size):
            feature = self.features[i][None]
            chunk_masks_low = []
            for (points,) in batch_iterator(self.points_per_batch, points_for_image):
                transformed_points = apply_coords(points, orig_size, self.inp_size)
                in_points = jnp.asarray(transformed_points, dtype=jnp.float32)[:, None, :]
                in_labels = jnp.ones((in_points.shape[0], 1), dtype=jnp.int32)
                low_res_masks = self._placeholder_mask_decoder(feature, dense_pe,
                                                               in_points, in_labels)
                chunk_masks_low.append(low_res_masks)

            # Collapse all point chunks into ONE fused-resize pallas_call over the
            # stacked (chunks*points) x channel axis (one long "parallel" grid).
            n_chunks = len(chunk_masks_low)
            P = chunk_masks_low[0].shape[0]
            all_low = jnp.concatenate(chunk_masks_low, axis=0)       # (n_chunks*P, 1, low, low)
            all_masks = self.postprocess_masks(all_low, self.inp_size, self.inp_size)
            # Restore the original (P, n_chunks, 1, H, W) stacking layout.
            batch_masks = jnp.transpose(
                all_masks.reshape(n_chunks, P, *all_masks.shape[1:]), (1, 0, 2, 3, 4))
            self.pred_mask = batch_masks   # NOTE: mirrors the reference quirk (last image kept)
        return self.pred_mask


if __name__ == "__main__":
    key = jax.random.PRNGKey(0)
    k_model, k_img, k_gt = jax.random.split(key, 3)

    inp_size = 32
    encoder_mode = dict(name='sam', embed_dim=48, depth=2, num_heads=4, mlp_ratio=4,
                        out_chans=32, qkv_bias=True, use_rel_pos=False, window_size=0,
                        global_attn_indexes=(), patch_size=8, prompt_embed_dim=32)

    model = AutomaticSAMPallas(inp_size=inp_size, encoder_mode=encoder_mode, loss='iou',
                               key=k_model, point_per_side=4, points_per_batch=8)

    x = jax.random.normal(k_img, (2, 3, inp_size, inp_size), dtype=jnp.float32)

    pred_mask = model.forward(x)                       # (8, 2, 1, 32, 32)
    jax.block_until_ready(pred_mask)

    # Exercise the provided loss modules (backward_G path) with ONE fused Pallas
    # partial-sum pass (bbce + bce + iou from a single HBM read of pred/gt).
    pred4 = pred_mask.reshape(-1, 1, inp_size, inp_size)
    # gt produced directly in bf16 (exact for 0/1 targets) -> 25% less loss-read traffic.
    gt = (jax.random.uniform(k_gt, pred4.shape) > 0.5).astype(jnp.bfloat16)
    losses = all_losses(pred4, gt)                     # (bbce, bce, iou)
    jax.block_until_ready(losses)

    print("KERNEL_OK")
</pallas_src>

<mosaic_0001>
module attributes {stable_mosaic.version = 11 : i64} {
  func.func @_pe_encoding_kernel(%arg0: memref<2x16xf32, #tpu.memory_space<vmem>>, %arg1: memref<16x2xf32, #tpu.memory_space<vmem>>, %arg2: memref<16x1xf32, #tpu.memory_space<vmem>>, %arg3: memref<32x16xf32, #tpu.memory_space<vmem>>) attributes {dimension_semantics = [], scalar_prefetch = 0 : i64, scratch_operands = 0 : i64, tpu.core_type = #tpu.core_type<tc>} {
    %c0 = arith.constant 0 : index
    %c0_0 = arith.constant 0 : index
    %0 = vector.load %arg0[%c0, %c0_0] : memref<2x16xf32, #tpu.memory_space<vmem>>, vector<2x16xf32>
    %c0_1 = arith.constant 0 : index
    %c0_2 = arith.constant 0 : index
    %1 = vector.load %arg1[%c0_1, %c0_2] : memref<16x2xf32, #tpu.memory_space<vmem>>, vector<16x2xf32>
    %2 = vector.extract_strided_slice %1 {offsets = [0, 0], sizes = [16, 1], strides = [1, 1]} : vector<16x2xf32> to vector<16x1xf32>
    %3 = vector.extract_strided_slice %0 {offsets = [0, 0], sizes = [1, 16], strides = [1, 1]} : vector<2x16xf32> to vector<1x16xf32>
    %4 = vector.broadcast %2 : vector<16x1xf32> to vector<16x16xf32>
    %5 = vector.broadcast %3 : vector<1x16xf32> to vector<16x16xf32>
    %6 = arith.mulf %4, %5 : vector<16x16xf32>
    %7 = vector.extract_strided_slice %1 {offsets = [0, 1], sizes = [16, 1], strides = [1, 1]} : vector<16x2xf32> to vector<16x1xf32>
    %8 = vector.extract_strided_slice %0 {offsets = [1, 0], sizes = [1, 16], strides = [1, 1]} : vector<2x16xf32> to vector<1x16xf32>
    %9 = vector.broadcast %7 : vector<16x1xf32> to vector<16x16xf32>
    %10 = vector.broadcast %8 : vector<1x16xf32> to vector<16x16xf32>
    %11 = arith.mulf %9, %10 : vector<16x16xf32>
    %12 = arith.addf %6, %11 : vector<16x16xf32>
    %c0_3 = arith.constant 0 : index
    %c0_4 = arith.constant 0 : index
    %13 = vector.load %arg2[%c0_3, %c0_4] : memref<16x1xf32, #tpu.memory_space<vmem>>, vector<16x1xf32>
    %14 = vector.broadcast %13 : vector<16x1xf32> to vector<16x16xf32>
    %15 = arith.addf %12, %14 : vector<16x16xf32>
    %16 = math.sin %15 : vector<16x16xf32>
    %c0_5 = arith.constant 0 : index
    %c0_6 = arith.constant 0 : index
    %17 = vector.load %arg3[%c0_5, %c0_6] : memref<32x16xf32, #tpu.memory_space<vmem>>, vector<16x16xf32>
    tpu.vector_store %arg3[%c0_5, %c0_6], %16 {strides = array<i32>} : memref<32x16xf32, #tpu.memory_space<vmem>>, vector<16x16xf32>,
    %18 = math.cos %15 : vector<16x16xf32>
    %c16 = arith.constant 16 : index
    %c0_7 = arith.constant 0 : index
    %19 = vector.load %arg3[%c16, %c0_7] : memref<32x16xf32, #tpu.memory_space<vmem>>, vector<16x16xf32>
    tpu.vector_store %arg3[%c16, %c0_7], %18 {strides = array<i32>} : memref<32x16xf32, #tpu.memory_space<vmem>>, vector<16x16xf32>,
    return
  }
}

</mosaic_0001>

<bundles_post_ra>
// kernel: tpu_custom_call.1
= control target key start
LH: loop header
LB: loop body
LE: loop exit
PB: predicated region body
PF: predicated region fallthrough
CT: control target
= control target key end

     0   :  { %v529_v0 = vmov 1   ;;  %v530_v1 = vmov 0   ;;  %v27_v6 = vlaneseq  ;;  %v531_v47 = vmov 683565275   ;;  %s650_s1 = inlined_call_operand.vmem [shape: f32[16,2], index: 1, kind: input, shape index: {}]   ;;  %s651_s2 = inlined_call_operand.vmem [shape: f32[16,1], index: 2, kind: input, shape index: {}]   ;;  %s652_s0 = inlined_call_operand.vmem [shape: f32[2,16], index: 0, kind: input, shape index: {}]   ;;  %s653_s3 = inlined_call_operand.vmem [shape: f32[32,16], index: 3, kind: output, shape index: {}]  }
   0x1   :  { %519 = vset.pattern.permute.xlu1 %v529_v0  ;;  %518 = vset.pattern.permute.xlu0 %v530_v1  ;;  %v15_v2 = vld [vmem:[%s650_s1] sm:$0xff]  ;;  %v16_v3 = vld [vmem:[%s650_s1 + $0x8] sm:$0xff]  ;;  %v532_v51 = vmov 2475754826   ;;  %v533_v53 = vmov 2131351028  }
   0x2   :  { %34 = vperm.xlu1 %519, %v15_v2   ;;  %19 = vperm.xlu0 %518, %v15_v2   ;;  %v49_v4 = vld [vmem:[%s651_s2] sm:$0xff]  ;;  %v50_v5 = vld [vmem:[%s651_s2 + $0x8] sm:$0xff]  ;;  %v28_v7 = vshrl.u32 %v27_v6, 7  ;;  %v534_v55 = vmov 2102212464  }
   0x3   :  { %v14_v10 = vld [vmem:[%s652_s0] sm:$0x3]  ;;  %v535_v57 = vmov 920167782   ;;  %v536_v0 = vmov 1326507024  }
   0x4   :  { %v43_v8 = vsub.s32 1, %v28_v7  ;;  %v29_v9 = vsub.s32 0, %v28_v7 }
   0x6   :  { %38 = vperm.xlu1 %519, %v16_v3   ;;  %24 = vperm.xlu0 %518, %v16_v3   ;;  %v44_v11 = vrot.slane %v14_v10, %v43_v8  ;;  %v30_v12 = vrot.slane %v14_v10, %v29_v9 }
   0xa   :  { %520 = vset.pattern.permute.xlu1 %v530_v1  ;;  %53 = vperm.xlu0 %518, %v49_v4  }
   0xb   :  { %58 = vperm.xlu1 %520, %v50_v5  }
  0x81   :  { %v35_v13 = vpop.permute.xlu1 %34  ;;  %v20_v14 = vpop.permute.xlu0 %19 }
  0x82   :  { %v45_v15 = vmul.f32 %v44_v11, %v35_v13  ;;  %v31_v16 = vmul.f32 %v30_v12, %v20_v14 }
  0x84   :  { %v47_v21 = vadd.f32 %v45_v15, %v31_v16 }
  0x85   :  { %v39_v17 = vpop.permute.xlu1 %38  ;;  %v25_v18 = vpop.permute.xlu0 %24 }
  0x86   :  { %v46_v19 = vmul.f32 %v44_v11, %v39_v17  ;;  %v32_v20 = vmul.f32 %v30_v12, %v25_v18 }
  0x88   :  { %v48_v22 = vadd.f32 %v46_v19, %v32_v20 }
  0x89   :  { %v54_v23 = vpop.permute.xlu0 %53 }
  0x8a   :  { %v572_v24 = vadd.f32 %v54_v23, %v47_v21  ;;  %v59_v25 = vpop.permute.xlu1 %58 }
  0x8b   :  { %v574_v26 = vadd.f32 %v59_v25, %v48_v22 }
  0x8c   :  { %v63_v27 = vand.u32 2147483647, %v572_v24  ;;  %v66_v28 = vand.u32 2139095040, %v572_v24  ;;  %vm65_vm14 = vcmp.lt.s32.totalorder %v572_v24, 0 }
  0x8d   :  { %v170_v29 = vand.u32 2139095040, %v574_v26  ;;  %v167_v32 = vand.u32 2147483647, %v574_v26 }
  0x8e   :  { %v67_v30 = vshrl.u32 %v66_v28, 23  ;;  %v70_v31 = vand.u32 8388607, %v63_v27  ;;  %vm64_vm15 = vcmp.le.f32.partialorder %v63_v27, 0.7853982 }
  0x8f   :  { %v171_v33 = vshrl.u32 %v170_v29, 23  ;;  %v584_v38 = vand.u32 8388607, %v167_v32 }
  0x90   :  { %v486_v34 = vadd.s32 4294967169, %v67_v30  ;;  %v71_v37 = vor.u32 8388608, %v70_v31 }
  0x91   :  { %v490_v35 = vadd.s32 4294967169, %v171_v33  ;;  %v175_v45 = vor.u32 8388608, %v584_v38 }
  0x92   :  { %v73_v36 = vadd.s32 1, %v486_v34  ;;  %v586_v44 = vshll.u32 %v71_v37, 8 }
  0x93   :  { %v177_v39 = vadd.s32 1, %v490_v35 }
  0x94   :  { %vm74_vm0 = vcmp.gt.s32.totalorder %v73_v36, 0 }
  0x95   :  { %v75_v40 = vsel %vm74_vm0, %v73_v36, 0  ;;  %vm178_vm1 = vcmp.gt.s32.totalorder %v177_v39, 0  ;;  %vm169_vm0 = vcmp.lt.s32.totalorder %v574_v26, 0 }
  0x96   :  { %v76_v41 = vshrl.u32 %v75_v40, 5  ;;  %v77_v42 = vand.u32 31, %v75_v40  ;;  %v179_v43 = vsel %vm178_vm1, %v177_v39, 0  ;;  %v215_v39 = vshll.u32 %v175_v45, 8 }
  0x97   :  { %v589_v49 = vshrl.u32 %v179_v43, 5  ;;  %v181_v50 = vand.u32 31, %v179_v43  ;;  %vm168_vm1 = vcmp.le.f32.partialorder %v167_v32, 0.7853982 }
  0x98   :  { %v78_v46 = vsub.s32 32, %v77_v42  ;;  %v80_v48 = vshll.u32 %v531_v47, %v77_v42  ;;  %v83_v52 = vshll.u32 %v532_v51, %v77_v42  ;;  %v86_v54 = vshll.u32 %v533_v53, %v77_v42 }
  0x99   :  { %v89_v56 = vshll.u32 %v534_v55, %v77_v42  ;;  %v92_v58 = vshll.u32 %v535_v57, %v77_v42  ;;  %vm95_vm2 = vcmp.lt.s32.totalorder %v76_v41, 1  ;;  %vm96_vm3 = vcmp.lt.s32.totalorder %v76_v41, 2 }
  0x9a   :  { %v81_v59 = vshrl.u32 %v532_v51, %v78_v46  ;;  %v84_v60 = vshrl.u32 %v533_v53, %v78_v46  ;;  %v87_v61 = vshrl.u32 %v534_v55, %v78_v46  ;;  %v79_v62 = vshrl.u32 %v531_v47, %v78_v46 }
  0x9b   :  { %v90_v63 = vshrl.u32 %v535_v57, %v78_v46  ;;  %v93_v1 = vshrl.u32 %v536_v0, %v78_v46  ;;  %v182_v5 = vsub.s32 32, %v181_v50  ;;  %vm97_vm4 = vcmp.lt.s32.totalorder %v76_v41, 3 }
  0x9c   :  { %v82_v2 = vor.u32 %v81_v59, %v80_v48  ;;  %v85_v3 = vor.u32 %v84_v60, %v83_v52  ;;  %v88_v4 = vor.u32 %v87_v61, %v86_v54  ;;  %vm98_vm5 = vcmp.lt.s32.totalorder %v76_v41, 4 }
  0x9d   :  { %v91_v6 = vor.u32 %v90_v63, %v89_v56  ;;  %v94_v7 = vor.u32 %v93_v1, %v92_v58  ;;  %v184_v15 = vshll.u32 %v531_v47, %v181_v50  ;;  %v185_v18 = vshrl.u32 %v532_v51, %v182_v5 }
  0x9e   :  { %v99_v8 = vsel %vm95_vm2, %v79_v62, %v82_v2  ;;  %v100_v9 = vsel %vm98_vm5, %v88_v4, 2102212464  ;;  %v103_v10 = vsel %vm95_vm2, %v82_v2, %v85_v3  ;;  %v107_v11 = vsel %vm95_vm2, %v85_v3, %v88_v4 }
  0x9f   :  { %v101_v12 = vsel %vm97_vm4, %v85_v3, %v100_v9  ;;  %v104_v13 = vsel %vm98_vm5, %v91_v6, 920167782  ;;  %v108_v14 = vsel %vm98_vm5, %v94_v7, 1326507024  ;;  %v187_v19 = vshll.u32 %v532_v51, %v181_v50 }
  0xa0   :  { %v105_v16 = vsel %vm97_vm4, %v88_v4, %v104_v13  ;;  %v109_v17 = vsel %vm97_vm4, %v91_v6, %v108_v14  ;;  %v102_v20 = vsel %vm96_vm3, %v99_v8, %v101_v12  ;;  %v188_v23 = vshrl.u32 %v533_v53, %v182_v5 }
  0xa1   :  { %v106_v21 = vsel %vm96_vm3, %v103_v10, %v105_v16  ;;  %v110_v22 = vsel %vm96_vm3, %v107_v11, %v109_v17  ;;  %v186_v31 = vor.u32 %v185_v18, %v184_v15  ;;  %v190_v34 = vshll.u32 %v533_v53, %v181_v50 }
  0xa2   :  { %v598_v25 = vmul.u32.u64.low %v586_v44, %v110_v22  ;;  %v599_v28 = vmul.u32.u64.high %v586_v44, %v110_v22, %v598_v25  ;;  %v602_v29 = vmul.u32.u64.low %v586_v44, %v106_v21  ;;  %v603_v30 = vmul.u32.u64.high %v586_v44, %v106_v21, %v602_v29 }
  0xa3   :  { %v189_v33 = vor.u32 %v188_v23, %v187_v19  ;;  %v191_v35 = vshrl.u32 %v534_v55, %v182_v5  ;;  %v193_v36 = vshll.u32 %v534_v55, %v181_v50  ;;  %v194_v37 = vshrl.u32 %v535_v57, %v182_v5 }
  0xa4   :  { %v197_v38 = vshrl.u32 %v536_v0, %v182_v5  ;;  %v118_v40 = vmul.u32 %v586_v44, %v102_v20  ;;  %v183_v41 = vshrl.u32 %v531_v47, %v182_v5  ;;  %v196_v43 = vshll.u32 %v535_v57, %v181_v50 }
  0xa5   :  { %v192_v42 = vor.u32 %v191_v35, %v190_v34  ;;  %vm120_vm6 = vc.u32 %v599_v28, %v602_v29  ;;  %v121_v46 = vadd.s32 1, %v603_v30  ;;  %v195_v48 = vor.u32 %v194_v37, %v193_v36 }
  0xa6   :  { %vm199_vm7 = vcmp.lt.s32.totalorder %v589_v49, 1  ;;  %v198_v51 = vor.u32 %v197_v38, %v196_v43  ;;  %vm201_vm8 = vcmp.lt.s32.totalorder %v589_v49, 3  ;;  %vm202_vm9 = vcmp.lt.s32.totalorder %v589_v49, 4 }
  0xa7   :  { %v207_v52 = vsel %vm199_vm7, %v186_v31, %v189_v33  ;;  %v122_v45 = vsel %vm120_vm6, %v121_v46, %v603_v30  ;;  %v204_v53 = vsel %vm202_vm9, %v192_v42, 2102212464  ;;  %v208_v44 = vsel %vm202_vm9, %v195_v48, 920167782 }
  0xa8   :  { %v211_v47 = vsel %vm199_vm7, %v189_v33, %v192_v42  ;;  %v123_v54 = vadd.s32 %v122_v45, %v118_v40  ;;  %vm200_vm10 = vcmp.lt.s32.totalorder %v589_v49, 2  ;;  %v209_v50 = vsel %vm201_vm8, %v192_v42, %v208_v44 }
  0xa9   :  { %v212_v55 = vsel %vm202_vm9, %v198_v51, 1326507024  ;;  %v203_v56 = vsel %vm199_vm7, %v183_v41, %v186_v31  ;;  %v205_v57 = vsel %vm201_vm8, %v189_v33, %v204_v53  ;;  %v210_v58 = vsel %vm200_vm10, %v207_v52, %v209_v50 }
  0xaa   :  { %v213_v59 = vsel %vm201_vm8, %v195_v48, %v212_v55  ;;  %v124_v60 = vadd.s32 536870912, %v123_v54  ;;  %v613_v62 = vmul.u32.u64.low %v215_v39, %v210_v58  ;;  %v614_v63 = vmul.u32.u64.high %v215_v39, %v210_v58, %v613_v62 }
  0xab   :  { %v214_v61 = vsel %vm200_vm10, %v211_v47, %v213_v59  ;;  %v206_v3 = vsel %vm200_vm10, %v203_v56, %v205_v57  ;;  %v119_v19 = vadd.s32 %v602_v29, %v599_v28  ;;  %vm271_vm2 = vcmask 130048  }
  0xac   :  { %v616_v0 = vmul.u32.u64.low %v215_v39, %v214_v61  ;;  %v617_v1 = vmul.u32.u64.high %v215_v39, %v214_v61, %v616_v0  ;;  %v125_v2 = vshrl.u32 %v124_v60, 30  ;;  %v225_v5 = vadd.s32 1, %v614_v63 }
  0xad   :  { %v222_v49 = vmul.u32 %v215_v39, %v206_v3  ;;  %vm155_vm9 = vweird.f32 %v572_v24 }
  0xae   :  { %v126_v4 = vshll.u32 %v125_v2, 30  ;;  %vm224_vm11 = vc.u32 %v617_v1, %v613_v62  ;;  %v223_v40 = vadd.s32 %v613_v62, %v617_v1  ;;  %v149_v29 = vsub.s32 4, %v125_v2 }
  0xaf   :  { %v226_v7 = vsel %vm224_vm11, %v225_v5, %v614_v63 }
  0xb0   :  { %v127_v6 = vsub.s32 %v123_v54, %v126_v4  ;;  %v227_v8 = vadd.s32 %v226_v7, %v222_v49  ;;  %v150_v44 = vsel %vm65_vm14, %v149_v29, %v125_v2 }
  0xb1   :  { %v152_v50 = vsel %vm64_vm15, 0, %v150_v44 }
  0xb2   :  { %v129_v9 = vsub.s32 0, %v127_v6  ;;  %v228_v10 = vadd.s32 536870912, %v227_v8  ;;  %v156_v59 = vadd.s32 3, %v152_v50  ;;  %v367_v63 = vand.u32 3, %v152_v50 }
  0xb4   :  { %v487_v11 = vmin.u32 %v129_v9, %v127_v6  ;;  %v229_v12 = vshrl.u32 %v228_v10, 30  ;;  %v157_v62 = vand.u32 3, %v156_v59  ;;  %vm369_vm4 = vcmp.eq.s32.totalorder %v367_v63, 0 }
  0xb5   :  { %vm372_vm5 = vcmp.eq.s32.totalorder %v367_v63, 2  ;;  %vm368_vm8 = vcmp.lt.s32.totalorder %v367_v63, 2 }
  0xb6   :  { %v131_v13 = vclz %v487_v11  ;;  %v230_v14 = vshll.u32 %v229_v12, 30  ;;  %v253_v58 = vsub.s32 4, %v229_v12  ;;  %vm162_vm3 = vcmp.eq.s32.totalorder %v157_v62, 2 }
  0xb7   :  { %vm159_vm6 = vcmp.eq.s32.totalorder %v157_v62, 0  ;;  %vm158_vm7 = vcmp.lt.s32.totalorder %v157_v62, 2 }
  0xb8   :  { %v488_v15 = vadd.s32 4294967294, %v131_v13  ;;  %v231_v16 = vsub.s32 %v227_v8, %v230_v14  ;;  %v254_v61 = vsel %vm169_vm0, %v253_v58, %v229_v12 }
  0xb9   :  { %v256_v2 = vsel %vm168_vm1, 0, %v254_v61 }
  0xba   :  { %vm489_vm12 = vcmp.lt.s32.totalorder %v488_v15, 0  ;;  %v233_v18 = vsub.s32 0, %v231_v16  ;;  %v470_v14 = vand.u32 3, %v256_v2 }
  0xbb   :  { %v134_v17 = vsel %vm489_vm12, 0, %v488_v15 }
  0xbc   :  { %v135_v20 = vsub.s32 32, %v134_v17  ;;  %v139_v21 = vsub.s32 4294967266, %v134_v17  ;;  %v491_v22 = vmin.u32 %v233_v18, %v231_v16  ;;  %v136_v23 = vshll.u32 %v127_v6, %v134_v17 }
  0xbd   :  { %v260_v6 = vadd.s32 3, %v256_v2  ;;  %vm475_vm11 = vcmp.eq.s32.totalorder %v470_v14, 2 }
  0xbe   :  { %v137_v25 = vshrl.u32 %v119_v19, %v135_v20  ;;  %v140_v30 = vadd.s32 127, %v139_v21  ;;  %v235_v31 = vclz %v491_v22 }
  0xbf   :  { %v261_v13 = vand.u32 3, %v260_v6 }
  0xc0   :  { %v138_v33 = vor.u32 %v137_v25, %v136_v23  ;;  %v141_v34 = vshll.u32 %v140_v30, 23  ;;  %v492_v35 = vadd.s32 4294967294, %v235_v31 }
  0xc1   :  { %vm266_vm10 = vcmp.eq.s32.totalorder %v261_v13, 2  ;;  %vm263_vm12 = vcmp.eq.s32.totalorder %v261_v13, 0 }
  0xc2   :  { %v142_v36 = vor.u32 4788187, %v141_v34  ;;  %vm493_vm13 = vcmp.lt.s32.totalorder %v492_v35, 0  ;;  %v145_v38 = vcvt.s32.f32 %v138_v33 }
  0xc3   :  { %v238_v39 = vsel %vm493_vm13, 0, %v492_v35  ;;  %vm472_vm13 = vcmp.eq.s32.totalorder %v470_v14, 0 }
  0xc4   :  { %v143_v37 = vand.u32 2147483647, %v142_v36  ;;  %v239_v41 = vsub.s32 32, %v238_v39  ;;  %v243_v42 = vsub.s32 4294967266, %v238_v39  ;;  %v240_v43 = vshll.u32 %v231_v16, %v238_v39 }
  0xc6   :  { %v146_v28 = vmul.f32 %v145_v38, %v143_v37  ;;  %v241_v46 = vshrl.u32 %v223_v40, %v239_v41  ;;  %v244_v48 = vadd.s32 127, %v243_v42 }
  0xc8   :  { %v147_v51 = vxor.u32 2147483648, %v146_v28  ;;  %v242_v52 = vor.u32 %v241_v46, %v240_v43  ;;  %v245_v45 = vshll.u32 %v244_v48, 23 }
  0xca   :  { %v148_v53 = vsel %vm65_vm14, %v147_v51, %v146_v28  ;;  %v246_v54 = vor.u32 4788187, %v245_v45  ;;  %v249_v56 = vcvt.s32.f32 %v242_v52  ;;  %vm262_vm14 = vcmp.lt.s32.totalorder %v261_v13, 2 }
  0xcb   :  { %v151_v47 = vsel %vm64_vm15, %v572_v24, %v148_v53  ;;  %vm471_vm15 = vcmp.lt.s32.totalorder %v470_v14, 2 }
  0xcc   :  { %521 = vcosq.f32 %v151_v47  ;;  %v247_v55 = vand.u32 2147483647, %v246_v54 }
  0xcd   :  { %523 = vsinq.f32 %v151_v47 }
  0xce   :  { %v250_v57 = vmul.f32 %v249_v56, %v247_v55 }
  0xd0   :  { %v251_v60 = vxor.u32 2147483648, %v250_v57 }
  0xd2   :  { %v252_v27 = vsel %vm169_vm0, %v251_v60, %v250_v57  ;;  %vm259_vm0 = vweird.f32 %v574_v26 }
  0xd3   :  { %v255_v0 = vsel %vm168_vm1, %v574_v26, %v252_v27 }
  0xd4   :  { %525 = vcosq.f32 %v255_v0 }
  0xd5   :  { %527 = vsinq.f32 %v255_v0 }
  0xd6   :  { %v522_v1 = vpop.eup %521 }
  0xd7   :  { %v524_v3 = vpop.eup %523  ;;  %v163_v4 = vxor.u32 2147483648, %v522_v1 }
  0xd8   :  { %v160_v5 = vxor.u32 2147483648, %v524_v3 }
  0xd9   :  { %v164_v49 = vsel %vm162_vm3, %v163_v4, %v524_v3  ;;  %v374_v32 = vsel %vm372_vm5, %v163_v4, %v524_v3 }
  0xda   :  { %v161_v7 = vsel %vm159_vm6, %v522_v1, %v160_v5  ;;  %v371_v8 = vsel %vm369_vm4, %v522_v1, %v160_v5 }
  0xdb   :  { %v165_v9 = vsel %vm158_vm7, %v161_v7, %v164_v49  ;;  %v375_v10 = vsel %vm368_vm8, %v371_v8, %v374_v32 }
  0xdc   :  { %v166_v11 = vsel %vm155_vm9, nan, %v165_v9  ;;  %v376_v12 = vsel %vm155_vm9, nan, %v375_v10 }
  0xdd   :  { %272 = vst.msk [vmem:[%s653_s3] sm:$0xff] %vm271_vm2, %v166_v11  ;;  %480 = vst.msk [vmem:[%s653_s3 + $0x10] sm:$0xff] %vm271_vm2, %v376_v12 }
  0xde   :  { %v526_v15 = vpop.eup %525 }
  0xdf   :  { %v528_v16 = vpop.eup %527  ;;  %v267_v17 = vxor.u32 2147483648, %v526_v15 }
  0xe0   :  { %v264_v24 = vxor.u32 2147483648, %v528_v16 }
  0xe1   :  { %v268_v18 = vsel %vm266_vm10, %v267_v17, %v528_v16  ;;  %v477_v19 = vsel %vm475_vm11, %v267_v17, %v528_v16 }
  0xe2   :  { %v265_v20 = vsel %vm263_vm12, %v526_v15, %v264_v24  ;;  %v474_v21 = vsel %vm472_vm13, %v526_v15, %v264_v24 }
  0xe3   :  { %v269_v22 = vsel %vm262_vm14, %v265_v20, %v268_v18  ;;  %v478_v23 = vsel %vm471_vm15, %v474_v21, %v477_v19 }
  0xe4   :  { %v270_v25 = vsel %vm259_vm0, nan, %v269_v22  ;;  %v479_v30 = vsel %vm259_vm0, nan, %v478_v23 }
  0xe5   :  { %273 = vst.msk [vmem:[%s653_s3 + $0x8] sm:$0xff] %vm271_vm2, %v270_v25  ;;  %481 = vst.msk [vmem:[%s653_s3 + $0x18] sm:$0xff] %vm271_vm2, %v479_v30 }

</bundles_post_ra>
